<compile_context>
chip_gen: v5e
topology: v5e:2x2
jax: 0.10.0
libtpu: 0.0.40
codegen_flags: <defaults>
</compile_context>

<pallas_src>
import math

import numpy as np

import jax
import jax.numpy as jnp
from jax.experimental import pallas as pl
from jax.experimental.pallas import tpu as pltpu

WIN = 11          # SSIM window size (win_size=11 in SSIMLoss)
SIGMA = 1.5       # win_sigma=1.5
PAD = WIN // 2


def _gauss_1d(win_size=WIN, sigma=SIGMA):
    g = [math.exp(-((x - win_size // 2) ** 2) / (2.0 * sigma * sigma))
         for x in range(win_size)]
    s = sum(g)
    return [v / s for v in g]


# Deterministic Gaussian window weights (compile-time constants).
GW = _gauss_1d()


def _band_matrix(n):
    """(n, n) symmetric banded matrix M with M[i, j] = GW[j - i + PAD].

    Left-multiplying (rows) / right-multiplying (cols) an image by it
    reproduces the separable 11-tap Gaussian 'same' convolution with zero
    padding, exactly matching F.conv2d(padding=win//2) with a symmetric
    Gaussian kernel.
    """
    m = np.zeros((n, n), np.float32)
    for i in range(n):
        for j in range(max(0, i - PAD), min(n, i + PAD + 1)):
            m[i, j] = GW[j - i + PAD]
    return m


def _vmem_limit_bytes():
    """Generation-aware scoped-VMEM limit (v7x has only 64 MiB per TC)."""
    cap = 64 * 1024 * 1024
    try:
        info = pltpu.get_tpu_info()
        cap = int(getattr(info, "vmem_capacity_bytes", cap))
    except Exception:
        pass  # conservative fallback (v7x-sized)
    if cap <= 64 * 1024 * 1024:
        return 40 * 1024 * 1024          # v7x: leave headroom below 64 MiB
    return 96 * 1024 * 1024              # v5e / v6e: 128 MiB physical


def _pick_batch(NC, H, W, in_bytes, budget):
    """Images-per-grid-step B: B | NC, block VMEM footprint within budget."""
    img = H * W

    def footprint(b):
        # 2 inputs x 2 pipeline buffers of (b, H, W) in the input dtype,
        # ~12 live (H, W) f32 per-image temps (fori_loop bounds live ranges),
        # plus the (double-buffered) (H,H)/(W,W) f32 conv matrices.
        return (4 * b * img * in_bytes) + 12 * img * 4 + 4 * (H * H + W * W) * 4

    feasible = [b for b in range(1, NC + 1)
                if NC % b == 0 and footprint(b) <= budget]
    return max(feasible) if feasible else 1


def _hybrid_kernel(ah_ref, aw_ref, p_ref, g_ref, l1_ref, ssim_ref):
    B = p_ref.shape[0]                 # images in this block (compile-time)
    ah = ah_ref[...]                   # (H, H) f32 row-pass band matrix
    aw = aw_ref[...]                   # (W, W) f32 column-pass band matrix

    C1 = 0.01 ** 2
    C2 = 0.03 ** 2

    def conv(x):                       # 11x11 Gaussian 'same' conv on the MXU
        t = jnp.dot(ah, x, preferred_element_type=jnp.float32)    # row pass
        return jnp.dot(t, aw, preferred_element_type=jnp.float32)  # col pass

    def body(b, carry):
        l1_acc, ssim_acc = carry
        # Upcast after the DMA (halves HBM traffic for half-precision inputs).
        p = p_ref[b].astype(jnp.float32)     # (H, W)
        g = g_ref[b].astype(jnp.float32)     # (H, W)

        # L1 partial first so (p - g) dies before the convs.
        l1_acc = l1_acc + jnp.sum(jnp.abs(p - g), keepdims=True)

        mu1 = conv(p)
        mu2 = conv(g)
        mu1_mu2 = mu1 * mu2
        sigma12 = conv(p * g) - mu1_mu2
        num = (2.0 * mu1_mu2 + C1) * (2.0 * sigma12 + C2)   # mu1_mu2/sigma12 die
        mu1_sq = mu1 * mu1
        mu2_sq = mu2 * mu2
        sigma1_sq = conv(p * p) - mu1_sq
        sigma2_sq = conv(g * g) - mu2_sq
        den = (mu1_sq + mu2_sq + C1) * (sigma1_sq + sigma2_sq + C2)
        ssim_map = num * pl.reciprocal(den, approx=True)
        ssim_acc = ssim_acc + jnp.sum(ssim_map, keepdims=True)
        return l1_acc, ssim_acc

    zero = jnp.zeros((1, 1), jnp.float32)
    l1_sum, ssim_sum = jax.lax.fori_loop(0, B, body, (zero, zero))

    l1_ref[...] = l1_sum.reshape(1, 1, 1)
    ssim_ref[...] = ssim_sum.reshape(1, 1, 1)


def hybrid_l1_ssim(pred, gt, weighted_r=(1.0, 0.1)):
    """loss = w0 * L1(pred, gt) + w1 * (1 - SSIM(pred, gt)).  Inputs NCHW."""
    N, C, H, W = pred.shape
    NC = N * C

    vmem_limit = _vmem_limit_bytes()
    in_bytes = jnp.dtype(pred.dtype).itemsize
    B = _pick_batch(NC, H, W, in_bytes, budget=int(0.6 * vmem_limit))
    G = NC // B

    # Free reshape — no HBM transpose pass, original layout streamed as-is.
    p3 = pred.reshape(NC, H, W)
    g3 = gt.reshape(NC, H, W)

    ah = jnp.asarray(_band_matrix(H))          # (H, H)
    aw = jnp.asarray(_band_matrix(W))          # (W, W)

    l1_parts, ssim_parts = pl.pallas_call(
        _hybrid_kernel,
        out_shape=(jax.ShapeDtypeStruct((G, 1, 1), jnp.float32),
                   jax.ShapeDtypeStruct((G, 1, 1), jnp.float32)),
        grid=(G,),
        in_specs=[pl.BlockSpec((H, H), lambda i: (0, 0)),       # constant index:
                  pl.BlockSpec((W, W), lambda i: (0, 0)),       # DMA'd once
                  pl.BlockSpec((B, H, W), lambda i: (i, 0, 0)),
                  pl.BlockSpec((B, H, W), lambda i: (i, 0, 0))],
        out_specs=(pl.BlockSpec((1, 1, 1), lambda i: (i, 0, 0)),
                   pl.BlockSpec((1, 1, 1), lambda i: (i, 0, 0))),
        compiler_params=pltpu.CompilerParams(
            dimension_semantics=("parallel",),
            vmem_limit_bytes=vmem_limit),
    )(ah, aw, p3, g3)

    denom = float(NC * H * W)
    l1 = jnp.sum(l1_parts) / denom
    ssim_mean = jnp.sum(ssim_parts) / denom
    return weighted_r[0] * l1 + weighted_r[1] * (1.0 - ssim_mean)


def _reference(pred, gt, weighted_r=(1.0, 0.1)):
    """Plain-JAX reference mirroring the PyTorch module (for verification)."""
    N, C, H, W = pred.shape
    gw = jnp.array(GW, jnp.float32)
    win2d = jnp.outer(gw, gw)
    window = jnp.broadcast_to(win2d, (C, 1, WIN, WIN)).astype(jnp.float32)

    def conv(x):
        return jax.lax.conv_general_dilated(
            x, window, window_strides=(1, 1),
            padding=((PAD, PAD), (PAD, PAD)),
            dimension_numbers=("NCHW", "OIHW", "NCHW"),
            feature_group_count=C)

    mu1 = conv(pred)
    mu2 = conv(gt)
    mu1_sq, mu2_sq, mu1_mu2 = mu1 * mu1, mu2 * mu2, mu1 * mu2
    sigma1_sq = conv(pred * pred) - mu1_sq
    sigma2_sq = conv(gt * gt) - mu2_sq
    sigma12 = conv(pred * gt) - mu1_mu2
    C1, C2 = 0.01 ** 2, 0.03 ** 2
    ssim_map = ((2 * mu1_mu2 + C1) * (2 * sigma12 + C2)) / (
        (mu1_sq + mu2_sq + C1) * (sigma1_sq + sigma2_sq + C2))
    l1 = jnp.mean(jnp.abs(pred - gt))
    ssim = jnp.mean(ssim_map)
    return weighted_r[0] * l1 + weighted_r[1] * (1.0 - ssim)


if __name__ == "__main__":
    key = jax.random.PRNGKey(0)
    k1, k2 = jax.random.split(key)
    # small shapes consistent with the module (NCHW images)
    pred = jax.random.uniform(k1, (2, 4, 16, 16), dtype=jnp.float32)
    gt = jax.random.uniform(k2, (2, 4, 16, 16), dtype=jnp.float32)

    loss = hybrid_l1_ssim(pred, gt)
    jax.block_until_ready(loss)

    ref = _reference(pred, gt)
    assert jnp.allclose(loss, ref, atol=1e-3, rtol=1e-3), (loss, ref)

    print("KERNEL_OK")
</pallas_src>

<mosaic_0001>
module attributes {stable_mosaic.version = 11 : i64} {
  func.func @_hybrid_kernel(%arg0: i32, %arg1: memref<16x16xf32, #tpu.memory_space<vmem>>, %arg2: memref<16x16xf32, #tpu.memory_space<vmem>>, %arg3: memref<8x16x16xf32, #tpu.memory_space<vmem>>, %arg4: memref<8x16x16xf32, #tpu.memory_space<vmem>>, %arg5: memref<1x1x1xf32, #tpu.memory_space<vmem>>, %arg6: memref<1x1x1xf32, #tpu.memory_space<vmem>>) attributes {dimension_semantics = [#tpu.dimension_semantics<parallel>], iteration_bounds = array<i64: 1>, scalar_prefetch = 0 : i64, scratch_operands = 0 : i64, tpu.core_type = #tpu.core_type<tc>, window_params = [{pipeline_mode = #tpu.pipeline_mode<synchronous>, transform_indices = @transform_0, window_bounds = array<i64: 16, 16>}, {pipeline_mode = #tpu.pipeline_mode<synchronous>, transform_indices = @transform_1, window_bounds = array<i64: 16, 16>}, {transform_indices = @transform_2, window_bounds = array<i64: 8, 16, 16>}, {transform_indices = @transform_3, window_bounds = array<i64: 8, 16, 16>}, {transform_indices = @transform_4, window_bounds = array<i64: 1, 1, 1>}, {transform_indices = @transform_5, window_bounds = array<i64: 1, 1, 1>}]} {
    %c0 = arith.constant 0 : index
    %c0_0 = arith.constant 0 : index
    %0 = vector.load %arg1[%c0, %c0_0] : memref<16x16xf32, #tpu.memory_space<vmem>>, vector<16x16xf32>
    %c0_1 = arith.constant 0 : index
    %c0_2 = arith.constant 0 : index
    %1 = vector.load %arg2[%c0_1, %c0_2] : memref<16x16xf32, #tpu.memory_space<vmem>>, vector<16x16xf32>
    %cst = arith.constant 0.000000e+00 : f32
    %2 = vector.broadcast %cst : f32 to vector<1x1xf32>
    %c0_i32 = arith.constant 0 : i32
    %c8_i32 = arith.constant 8 : i32
    %3 = arith.addi %c0_i32, %c8_i32 : i32
    %c1_i32 = arith.constant 1 : i32
    %4:2 = scf.for %arg7 = %c0_i32 to %3 step %c1_i32 iter_args(%arg8 = %2, %arg9 = %2) -> (vector<1x1xf32>, vector<1x1xf32>)  : i32 {
      %9 = arith.index_cast %arg7 : i32 to index
      %c0_10 = arith.constant 0 : index
      %c0_11 = arith.constant 0 : index
      %10 = vector.load %arg3[%9, %c0_10, %c0_11] : memref<8x16x16xf32, #tpu.memory_space<vmem>>, vector<1x16x16xf32>
      %11 = vector.shape_cast %10 : vector<1x16x16xf32> to vector<16x16xf32>
      %12 = arith.index_cast %arg7 : i32 to index
      %c0_12 = arith.constant 0 : index
      %c0_13 = arith.constant 0 : index
      %13 = vector.load %arg4[%12, %c0_12, %c0_13] : memref<8x16x16xf32, #tpu.memory_space<vmem>>, vector<1x16x16xf32>
      %14 = vector.shape_cast %13 : vector<1x16x16xf32> to vector<16x16xf32>
      %15 = arith.subf %11, %14 : vector<16x16xf32>
      %16 = math.absf %15 : vector<16x16xf32>
      %17 = vector.shape_cast %16 : vector<16x16xf32> to vector<1x16x16xf32>
      %cst_14 = arith.constant dense<0.000000e+00> : vector<1xf32>
      %18 = vector.multi_reduction <add>, %17, %cst_14 [1, 2] : vector<1x16x16xf32> to vector<1xf32>
      %19 = vector.shape_cast %18 : vector<1xf32> to vector<1x1x1xf32>
      %20 = vector.extract %19[0, 0, 0] : f32 from vector<1x1x1xf32>
      %21 = vector.broadcast %20 : f32 to vector<1x1xf32>
      %22 = arith.addf %arg8, %21 : vector<1x1xf32>
      %cst_15 = arith.constant dense<0.000000e+00> : vector<16x16xf32>
      %23 = tpu.matmul %0, %11, %cst_15 {dimension_numbers = #tpu.dot_dimension_numbers<[1], [0], [0], [1], [0, 0, 1, 1], [], []>} : vector<16x16xf32>, vector<16x16xf32>, vector<16x16xf32> -> vector<16x16xf32>
      %cst_16 = arith.constant dense<0.000000e+00> : vector<16x16xf32>
      %24 = tpu.matmul %23, %1, %cst_16 {dimension_numbers = #tpu.dot_dimension_numbers<[1], [0], [0], [1], [0, 0, 1, 1], [], []>} : vector<16x16xf32>, vector<16x16xf32>, vector<16x16xf32> -> vector<16x16xf32>
      %cst_17 = arith.constant dense<0.000000e+00> : vector<16x16xf32>
      %25 = tpu.matmul %0, %14, %cst_17 {dimension_numbers = #tpu.dot_dimension_numbers<[1], [0], [0], [1], [0, 0, 1, 1], [], []>} : vector<16x16xf32>, vector<16x16xf32>, vector<16x16xf32> -> vector<16x16xf32>
      %cst_18 = arith.constant dense<0.000000e+00> : vector<16x16xf32>
      %26 = tpu.matmul %25, %1, %cst_18 {dimension_numbers = #tpu.dot_dimension_numbers<[1], [0], [0], [1], [0, 0, 1, 1], [], []>} : vector<16x16xf32>, vector<16x16xf32>, vector<16x16xf32> -> vector<16x16xf32>
      %27 = arith.mulf %24, %26 : vector<16x16xf32>
      %28 = arith.mulf %11, %14 : vector<16x16xf32>
      %cst_19 = arith.constant dense<0.000000e+00> : vector<16x16xf32>
      %29 = tpu.matmul %0, %28, %cst_19 {dimension_numbers = #tpu.dot_dimension_numbers<[1], [0], [0], [1], [0, 0, 1, 1], [], []>} : vector<16x16xf32>, vector<16x16xf32>, vector<16x16xf32> -> vector<16x16xf32>
      %cst_20 = arith.constant dense<0.000000e+00> : vector<16x16xf32>
      %30 = tpu.matmul %29, %1, %cst_20 {dimension_numbers = #tpu.dot_dimension_numbers<[1], [0], [0], [1], [0, 0, 1, 1], [], []>} : vector<16x16xf32>, vector<16x16xf32>, vector<16x16xf32> -> vector<16x16xf32>
      %31 = arith.subf %30, %27 : vector<16x16xf32>
      %cst_21 = arith.constant 2.000000e+00 : f32
      %32 = vector.broadcast %cst_21 : f32 to vector<16x16xf32>
      %33 = arith.mulf %32, %27 : vector<16x16xf32>
      %cst_22 = arith.constant 9.99999974E-5 : f32
      %34 = vector.broadcast %cst_22 : f32 to vector<16x16xf32>
      %35 = arith.addf %33, %34 : vector<16x16xf32>
      %cst_23 = arith.constant 2.000000e+00 : f32
      %36 = vector.broadcast %cst_23 : f32 to vector<16x16xf32>
      %37 = arith.mulf %36, %31 : vector<16x16xf32>
      %cst_24 = arith.constant 8.99999984E-4 : f32
      %38 = vector.broadcast %cst_24 : f32 to vector<16x16xf32>
      %39 = arith.addf %37, %38 : vector<16x16xf32>
      %40 = arith.mulf %35, %39 : vector<16x16xf32>
      %41 = arith.mulf %24, %24 : vector<16x16xf32>
      %42 = arith.mulf %26, %26 : vector<16x16xf32>
      %43 = arith.mulf %11, %11 : vector<16x16xf32>
      %cst_25 = arith.constant dense<0.000000e+00> : vector<16x16xf32>
      %44 = tpu.matmul %0, %43, %cst_25 {dimension_numbers = #tpu.dot_dimension_numbers<[1], [0], [0], [1], [0, 0, 1, 1], [], []>} : vector<16x16xf32>, vector<16x16xf32>, vector<16x16xf32> -> vector<16x16xf32>
      %cst_26 = arith.constant dense<0.000000e+00> : vector<16x16xf32>
      %45 = tpu.matmul %44, %1, %cst_26 {dimension_numbers = #tpu.dot_dimension_numbers<[1], [0], [0], [1], [0, 0, 1, 1], [], []>} : vector<16x16xf32>, vector<16x16xf32>, vector<16x16xf32> -> vector<16x16xf32>
      %46 = arith.subf %45, %41 : vector<16x16xf32>
      %47 = arith.mulf %14, %14 : vector<16x16xf32>
      %cst_27 = arith.constant dense<0.000000e+00> : vector<16x16xf32>
      %48 = tpu.matmul %0, %47, %cst_27 {dimension_numbers = #tpu.dot_dimension_numbers<[1], [0], [0], [1], [0, 0, 1, 1], [], []>} : vector<16x16xf32>, vector<16x16xf32>, vector<16x16xf32> -> vector<16x16xf32>
      %cst_28 = arith.constant dense<0.000000e+00> : vector<16x16xf32>
      %49 = tpu.matmul %48, %1, %cst_28 {dimension_numbers = #tpu.dot_dimension_numbers<[1], [0], [0], [1], [0, 0, 1, 1], [], []>} : vector<16x16xf32>, vector<16x16xf32>, vector<16x16xf32> -> vector<16x16xf32>
      %50 = arith.subf %49, %42 : vector<16x16xf32>
      %51 = arith.addf %41, %42 : vector<16x16xf32>
      %cst_29 = arith.constant 9.99999974E-5 : f32
      %52 = vector.broadcast %cst_29 : f32 to vector<16x16xf32>
      %53 = arith.addf %51, %52 : vector<16x16xf32>
      %54 = arith.addf %46, %50 : vector<16x16xf32>
      %cst_30 = arith.constant 8.99999984E-4 : f32
      %55 = vector.broadcast %cst_30 : f32 to vector<16x16xf32>
      %56 = arith.addf %54, %55 : vector<16x16xf32>
      %57 = arith.mulf %53, %56 : vector<16x16xf32>
      %58 = tpu.reciprocal %57 {approx = true} : vector<16x16xf32> -> vector<16x16xf32>
      %59 = arith.mulf %40, %58 : vector<16x16xf32>
      %60 = vector.shape_cast %59 : vector<16x16xf32> to vector<1x16x16xf32>
      %cst_31 = arith.constant dense<0.000000e+00> : vector<1xf32>
      %61 = vector.multi_reduction <add>, %60, %cst_31 [1, 2] : vector<1x16x16xf32> to vector<1xf32>
      %62 = vector.shape_cast %61 : vector<1xf32> to vector<1x1x1xf32>
      %63 = vector.extract %62[0, 0, 0] : f32 from vector<1x1x1xf32>
      %64 = vector.broadcast %63 : f32 to vector<1x1xf32>
      %65 = arith.addf %arg9, %64 : vector<1x1xf32>
      scf.yield %22, %65 : vector<1x1xf32>, vector<1x1xf32>
    }
    %c8_i32_3 = arith.constant 8 : i32
    %5 = vector.shape_cast %4#0 : vector<1x1xf32> to vector<1x1x1xf32>
    %c0_4 = arith.constant 0 : index
    %c0_5 = arith.constant 0 : index
    %c0_6 = arith.constant 0 : index
    %6 = vector.load %arg5[%c0_4, %c0_5, %c0_6] : memref<1x1x1xf32, #tpu.memory_space<vmem>>, vector<1x1x1xf32>
    tpu.vector_store %arg5[%c0_4, %c0_5, %c0_6], %5 {strides = array<i32>} : memref<1x1x1xf32, #tpu.memory_space<vmem>>, vector<1x1x1xf32>,
    %7 = vector.shape_cast %4#1 : vector<1x1xf32> to vector<1x1x1xf32>
    %c0_7 = arith.constant 0 : index
    %c0_8 = arith.constant 0 : index
    %c0_9 = arith.constant 0 : index
    %8 = vector.load %arg6[%c0_7, %c0_8, %c0_9] : memref<1x1x1xf32, #tpu.memory_space<vmem>>, vector<1x1x1xf32>
    tpu.vector_store %arg6[%c0_7, %c0_8, %c0_9], %7 {strides = array<i32>} : memref<1x1x1xf32, #tpu.memory_space<vmem>>, vector<1x1x1xf32>,
    return
  }
  func.func @transform_0(%arg0: i32) -> (i32, i32) {
    %c0_i32 = arith.constant 0 : i32
    %c0_i32_0 = arith.constant 0 : i32
    %c0_i32_1 = arith.constant 0 : i32
    return %c0_i32, %c0_i32_0 : i32, i32
  }
  func.func @transform_1(%arg0: i32) -> (i32, i32) {
    %c0_i32 = arith.constant 0 : i32
    %c0_i32_0 = arith.constant 0 : i32
    %c0_i32_1 = arith.constant 0 : i32
    return %c0_i32, %c0_i32_0 : i32, i32
  }
  func.func @transform_2(%arg0: i32) -> (i32, i32, i32) {
    %c0_i32 = arith.constant 0 : i32
    %c0_i32_0 = arith.constant 0 : i32
    %c0_i32_1 = arith.constant 0 : i32
    return %arg0, %c0_i32, %c0_i32_0 : i32, i32, i32
  }
  func.func @transform_3(%arg0: i32) -> (i32, i32, i32) {
    %c0_i32 = arith.constant 0 : i32
    %c0_i32_0 = arith.constant 0 : i32
    %c0_i32_1 = arith.constant 0 : i32
    return %arg0, %c0_i32, %c0_i32_0 : i32, i32, i32
  }
  func.func @transform_4(%arg0: i32) -> (i32, i32, i32) {
    %c0_i32 = arith.constant 0 : i32
    %c0_i32_0 = arith.constant 0 : i32
    %c0_i32_1 = arith.constant 0 : i32
    return %arg0, %c0_i32, %c0_i32_0 : i32, i32, i32
  }
  func.func @transform_5(%arg0: i32) -> (i32, i32, i32) {
    %c0_i32 = arith.constant 0 : i32
    %c0_i32_0 = arith.constant 0 : i32
    %c0_i32_1 = arith.constant 0 : i32
    return %arg0, %c0_i32, %c0_i32_0 : i32, i32, i32
  }
}

</mosaic_0001>

<bundles_post_ra>
// kernel: tpu_custom_call.1
= control target key start
LH: loop header
LB: loop body
LE: loop exit
PB: predicated region body
PF: predicated region fallthrough
CT: control target
= control target key end

     0   :  { %11 = vsyncpa [#allocation3], 0  ;;  %s898_s0 = inlined_call_operand.hbm [shape: f32[16,16], index: 0, kind: input, shape index: {}]   ;;  %s899_s1 = inlined_call_operand.hbm [shape: f32[16,16], index: 1, kind: input, shape index: {}]   ;;  %s900_s2 = inlined_call_operand.hbm [shape: f32[8,16,16], index: 2, kind: input, shape index: {}]   ;;  %s901_s3 = inlined_call_operand.hbm [shape: f32[8,16,16], index: 3, kind: input, shape index: {}]   ;;  %s902_s4 = inlined_call_operand.hbm [shape: f32[1,1,1], index: 4, kind: output, shape index: {0}]   ;;  %s903_s5 = inlined_call_operand.hbm [shape: f32[1,1,1], index: 5, kind: output, shape index: {1}]  }
   0x1   :  { %12 = vsyncpa [#allocation6], 0 }
   0x2   :  { %13 = vsyncpa [#allocation9], 0 }
   0x3   :  { %14 = vsyncpa [#allocation4], 0 }
   0x4   :  { %15 = vsyncpa [#allocation12], 0  ;;  %s33_s20 = sshll.u32 %s899_s1, 4  ;;  %s740_s21 = smov [#allocation5]   ;;  %s34_s20 = int_to_ptr.hbm [resolvable:$true] %s33_s20 }
   0x5   :  { %s35_s22 = sshll.u32 %s740_s21, 4  ;;  %s20_s25 = sshll.u32 %s898_s0, 4  ;;  %s36_s22 = int_to_ptr.vmem [resolvable:$true] %s35_s22  ;;  %s21_s25 = int_to_ptr.hbm [resolvable:$true] %s20_s25 }
   0x6   :  { %s741_s26 = smov 128   ;;  %s742_s27 = smov 8  }
   0x7   :  { %41 = dma.hbm_to_vmem [thread:$0]  %s34_s20, 256, %s36_s22, [#allocation6], %s741_s26, %s741_s26, %s742_s27  }
   0x8   :  { %s743_s28 = smov [#allocation2]   ;;  %s46_s7 = sshll.u32 %s900_s2, 4  ;;  %s47_s7 = int_to_ptr.hbm [resolvable:$true] %s46_s7 }
   0x9   :  { %s22_s29 = sshll.u32 %s743_s28, 4  ;;  %s59_s9 = sshll.u32 %s901_s3, 4  ;;  %s23_s29 = int_to_ptr.vmem [resolvable:$true] %s22_s29  ;;  %s60_s9 = int_to_ptr.hbm [resolvable:$true] %s59_s9 }
   0xa   :  { %28 = dma.hbm_to_vmem [thread:$0]  %s21_s25, 256, %s23_s29, [#allocation3], %s741_s26, %s741_s26, %s742_s27  }
   0xb   :  { %s744_s10 = smov [#allocation7]   ;;  %s745_s0 = smov [#allocation8]  }
   0xc   :  { %s48_s11 = sshll.u32 %s744_s10, 4  ;;  %s61_s12 = sshll.u32 %s745_s0, 4  ;;  %s49_s11 = int_to_ptr.vmem [resolvable:$true] %s48_s11  ;;  %s62_s12 = int_to_ptr.vmem [resolvable:$true] %s61_s12 }
   0xd   :  { %54 = dma.hbm_to_vmem [thread:$0]  %s47_s7, 2048, %s49_s11, [#allocation6], %s741_s26, %s741_s26, %s742_s27  }
   0xe   :  { %67 = dma.hbm_to_vmem [thread:$0]  %s60_s9, 2048, %s62_s12, [#allocation9], %s741_s26, %s741_s26, %s742_s27  }
   0xf   :  { %718 = dma.done.wait [#allocation3], 256  }
  0x10   :  { %719 = vsyncadd [#allocation3], 4294967040 }
  0x11   :  { %720 = dma.done.wait [#allocation6], 2304  }
  0x12   :  { %721 = vsyncadd [#allocation6], 4294964992 }
  0x13   :  { %722 = dma.done.wait [#allocation9], 2048  }
  0x14   :  { %723 = vsyncadd [#allocation9], 4294965248  ;;  %v790_v0 = vld [vmem:[#allocation2] sm:$0xff]  ;;  %v792_v1 = vld [vmem:[#allocation2 + $0x8] sm:$0xff]  ;;  %v798_v4 = vmov 0.0   ;;  %v800_v5 = vmov 0.0  }
  0x15   :  { %v794_v2 = vld [vmem:[#allocation5] sm:$0xff]  ;;  %v796_v3 = vld [vmem:[#allocation5 + $0x8] sm:$0xff]  ;;  %s802_s2 = smov 0  }
  0x16 LB: > { %171 = vmatpush.msra.mxu1 %v796_v3  ;;  %520 = vmatpush.msra.mxu3 %v796_v3  ;;  %s497_s3 = sshll.u32 %s738_s2, 4  ;;  %vm107_vm0 = vcmask 130048   ;;  %s93_s2 = sadd.s32 1, %s738_s2   ;;  %s738_s2 = sphi %s802_s2, %s93_s2   ;;  %v734_v5 = vphi %v800_v5, %v905_v5   ;;  %v730_v4 = vphi %v798_v4, %v904_v4  }
  0x17   : > { %s97_s13 = scalar_lea.vmem [#allocation7], %s497_s3  ;;  %s100_s14 = scalar_lea.vmem [#allocation8], %s497_s3 }
  0x18   : > { %172 = vmatpush.msra.mxu1 %v794_v2  ;;  %521 = vmatpush.msra.mxu3 %v794_v2  ;;  %v820_v6 = vld [vmem:[%s97_s13 + $0x8] sm:$0xff]  ;;  %v822_v7 = vld [vmem:[%s97_s13] sm:$0xff]  ;;  %p90_p0 = scmp.ge.s32.totalorder %s93_s2, 8  }
  0x19   : > { %v824_v8 = vld [vmem:[%s100_s14 + $0x8] sm:$0xff]  ;;  %142 = vmatpush.msra.mxu0 %v820_v6  ;;  %518 = vmatpush.msra.mxu2 %v820_v6  ;;  %v101_v9 = vld [vmem:[%s100_s14] sm:$0xff]  ;;  %v305_v12 = vmul.f32 %v820_v6, %v820_v6  ;;  %v304_v14 = vmul.f32 %v822_v7, %v822_v7  ;;  %vm444_vm1 = vcmask (%p90_p0), 0   ;;  %s454_s19 = sshll.u32 (%p90_p0), %s902_s4, 4  ;;  %s746_s20 = smov (%p90_p0), [#allocation10]   ;;  %s455_s19 = int_to_ptr.hbm [resolvable:$true] %s454_s19 }
  0x1a   : > { %279 = vmatpush.msrb.mxu1 %v796_v3  ;;  %223 = vmatpush.msrb.mxu3 %v796_v3  ;;  %v235_v10 = vmul.f32 %v824_v8, %v820_v6  ;;  %v234_v11 = vmul.f32 %v101_v9, %v822_v7  ;;  %v361_v13 = vmul.f32 %v824_v8, %v824_v8  ;;  %s452_s21 = sshll.u32 (%p90_p0), %s746_s20, 4  ;;  %s747_s22 = smov (%p90_p0), [#allocation11]   ;;  %s453_s21 = int_to_ptr.vmem [resolvable:$true] %s452_s21 }
  0x1b   : > { %143 = vmatpush.msra.mxu0 %v822_v7  ;;  %519 = vmatpush.msra.mxu2 %v822_v7  ;;  %v360_v15 = vmul.f32 %v101_v9, %v101_v9  ;;  %v103_v29 = vsub.f32 %v822_v7, %v101_v9  ;;  %v104_v30 = vsub.f32 %v820_v6, %v824_v8  ;;  %s463_s23 = sshll.u32 (%p90_p0), %s747_s22, 4  ;;  %s465_s26 = sshll.u32 (%p90_p0), %s903_s5, 4  ;;  %s464_s23 = int_to_ptr.vmem [resolvable:$true] %s463_s23  ;;  %s466_s26 = int_to_ptr.hbm [resolvable:$true] %s465_s26 }
  0x1c   : > { %280 = vmatpush.msrb.mxu1 %v794_v2  ;;  %224 = vmatpush.msrb.mxu3 %v794_v2 }
  0x1d   : > { %498 = vmatmul.msk.f32.vlgmr.msra.gmra.mxu0 %vm107_vm0, %v790_v0  ;;  %499 = vmatmul.msk.f32.vlgmr.msra.gmra.mxu2 %vm107_vm0, %v792_v1  ;;  %v105_v31 = vand.u32 2147483647, %v103_v29  ;;  %v106_v32 = vand.u32 2147483647, %v104_v30 }
  0x1e   : > { %194 = vmatpush.msrb.mxu2 %v824_v8  ;;  %250 = vmatpush.msrb.mxu0 %v235_v10 }
  0x1f   : > { %v108_v33 = vsel %vm107_vm0, %v105_v31, 0.0  ;;  %v109_v34 = vsel %vm107_vm0, %v106_v32, 0.0 }
  0x20   : > { %195 = vmatpush.msrb.mxu2 %v101_v9  ;;  %251 = vmatpush.msrb.mxu0 %v234_v11  ;;  %v110_v35 = vadd.f32 %v109_v34, %v108_v33 }
  0x22   : > { %320 = vmatpush.msra.mxu2 %v305_v12  ;;  %376 = vmatpush.msra.mxu0 %v361_v13 }
  0x23   : > { %111 = vadd.xlane.f32.xlu0 %v110_v35 }
  0x24   : > { %321 = vmatpush.msra.mxu2 %v304_v14  ;;  %377 = vmatpush.msra.mxu0 %v360_v15 }
  0x25   : > { %502 = vmatmul.msk.f32.vlgmr.msrb.gmra.mxu2 %vm107_vm0, %v790_v0  ;;  %506 = vmatmul.msk.f32.vlgmr.msrb.gmra.mxu0 %vm107_vm0, %v790_v0 }
  0x2d   : > { %503 = vmatmul.msk.f32.gmra.mxu2 %vm107_vm0, %v792_v1  ;;  %507 = vmatmul.msk.f32.gmra.mxu0 %vm107_vm0, %v792_v1 }
  0x35   : > { %510 = vmatmul.msk.f32.vlgmr.msra.gmra.mxu2 %vm107_vm0, %v790_v0  ;;  %514 = vmatmul.msk.f32.vlgmr.msra.gmra.mxu0 %vm107_vm0, %v790_v0 }
  0x3d   : > { %511 = vmatmul.msk.f32.gmra.mxu2 %vm107_vm0, %v792_v1  ;;  %515 = vmatmul.msk.f32.gmra.mxu0 %vm107_vm0, %v792_v1 }
  0x9a   : > { %v145_v16 = vpop.f32.mrf.mxu0 }
  0x9b   : > { %500 = vmatmul.msk.f32.vlgmr.msra.gmra.mxu1 %vm107_vm0, %v145_v16 }
  0x9c   : > { %405 = vmatpush.msra.mxu1 %v796_v3 }
  0x9e   : > { %406 = vmatpush.msra.mxu1 %v794_v2 }
  0xa0   : > { %v148_v17 = vpop.f32.mrf.mxu2 }
  0xa1   : > { %501 = vmatmul.msk.f32.vlgmr.msra.gmra.mxu3 %vm107_vm0, %v148_v17 }
  0xa2   : > { %v253_v18 = vpop.f32.mrf.mxu0  ;;  %349 = vmatpush.msra.mxu3 %v796_v3 }
  0xa3   : > { %508 = vmatmul.msk.f32.vlgmr.msrb.gmra.mxu1 %vm107_vm0, %v253_v18 }
  0xa4   : > { %350 = vmatpush.msra.mxu3 %v794_v2 }
  0xa8   : > { %v197_v19 = vpop.f32.mrf.mxu2 }
  0xa9   : > { %504 = vmatmul.msk.f32.vlgmr.msrb.gmra.mxu3 %vm107_vm0, %v197_v19 }
  0xaa   : > { %v256_v20 = vpop.f32.mrf.mxu0 }
  0xab   : > { %509 = vmatmul.msk.f32.gmra.mxu1 %vm107_vm0, %v256_v20 }
  0xb0   : > { %v200_v21 = vpop.f32.mrf.mxu2 }
  0xb1   : > { %505 = vmatmul.msk.f32.gmra.mxu3 %vm107_vm0, %v200_v21 }
  0xb2   : > { %v379_v22 = vpop.f32.mrf.mxu0 }
  0xb3   : > { %516 = vmatmul.msk.f32.vlgmr.msra.gmra.mxu1 %vm107_vm0, %v379_v22 }
  0xb8   : > { %v323_v23 = vpop.f32.mrf.mxu2 }
  0xb9   : > { %512 = vmatmul.msk.f32.vlgmr.msra.gmra.mxu3 %vm107_vm0, %v323_v23 }
  0xba   : > { %v382_v24 = vpop.f32.mrf.mxu0 }
  0xbb   : > { %517 = vmatmul.msk.f32.gmra.mxu1 %vm107_vm0, %v382_v24  ;;  %v112_v24 = vpop.xlane.xlu0 %111 }
  0xc0   : > { %v326_v25 = vpop.f32.mrf.mxu2 }
  0xc1   : > { %513 = vmatmul.msk.f32.gmra.mxu3 %vm107_vm0, %v326_v25  ;;  %v113_v25 = vrot.slane %v112_v24, 4 }
 0x118   : > { %v174_v26 = vpop.f32.mrf.mxu1 }
 0x119   : > { %v300_v40 = vmul.f32 %v174_v26, %v174_v26 }
 0x120   : > { %v282_v27 = vpop.f32.mrf.mxu1 }
 0x124   : > { %v177_v28 = vpop.f32.mrf.mxu3 }
 0x125   : > { %v301_v52 = vmul.f32 %v177_v28, %v177_v28 }
 0x128   : > { %v285_v37 = vpop.f32.mrf.mxu1 }
 0x12c   : > { %v226_v36 = vpop.f32.mrf.mxu3 }
 0x12d   : > { %v302_v41 = vmul.f32 %v226_v36, %v226_v36  ;;  %v232_v47 = vmul.f32 %v226_v36, %v174_v26  ;;  %v114_v26 = vadd.f32 %v113_v25, %v112_v24 }
 0x12f   : > { %v416_v45 = vadd.f32 %v302_v41, %v300_v40  ;;  %v288_v54 = vsub.f32 %v282_v27, %v232_v47  ;;  %v290_v7 = vmul.f32 2.0, %v232_v47  ;;  %v115_v27 = vrot.slane %v114_v26, 2 }
 0x130   : > { %v408_v39 = vpop.f32.mrf.mxu1 }
 0x131   : > { %v414_v43 = vsub.f32 %v408_v39, %v302_v41  ;;  %v418_v53 = vadd.f32 0.0001, %v416_v45  ;;  %v294_v62 = vmul.f32 2.0, %v288_v54  ;;  %v292_v12 = vadd.f32 0.0001, %v290_v7 }
 0x133   : > { %v296_v10 = vadd.f32 0.0009, %v294_v62 }
 0x134   : > { %v229_v38 = vpop.f32.mrf.mxu3 }
 0x135   : > { %v303_v48 = vmul.f32 %v229_v38, %v229_v38  ;;  %v233_v50 = vmul.f32 %v229_v38, %v177_v28  ;;  %v298_v15 = vmul.f32 %v296_v10, %v292_v12  ;;  %v116_v28 = vadd.f32 %v115_v27, %v114_v26 }
 0x137   : > { %v417_v56 = vadd.f32 %v303_v48, %v301_v52  ;;  %v289_v60 = vsub.f32 %v285_v37, %v233_v50  ;;  %v291_v11 = vmul.f32 2.0, %v233_v50  ;;  %v117_v29 = vrot.slane %v116_v28, 1 }
 0x138   : > { %v411_v51 = vpop.f32.mrf.mxu1 }
 0x139   : > { %v415_v57 = vsub.f32 %v411_v51, %v303_v48  ;;  %v419_v63 = vadd.f32 0.0001, %v417_v56  ;;  %v295_v8 = vmul.f32 2.0, %v289_v60  ;;  %v293_v16 = vadd.f32 0.0001, %v291_v11 }
 0x13a   : > { %v118_v30 = vadd.f32 %v117_v29, %v116_v28 }
 0x13b   : > { %v297_v13 = vadd.f32 0.0009, %v295_v8 }
 0x13c   : > { %v352_v42 = vpop.f32.mrf.mxu3  ;;  %522 = vpush %v118_v30 }
 0x13d   : > { %v358_v44 = vsub.f32 %v352_v42, %v300_v40  ;;  %v299_v17 = vmul.f32 %v297_v13, %v293_v16 }
 0x13f   : > { %v420_v46 = vadd.f32 %v414_v43, %v358_v44 }
 0x141   : > { %v422_v49 = vadd.f32 0.0009, %v420_v46 }
 0x143   : > { %v424_v58 = vmul.f32 %v422_v49, %v418_v53 }
 0x144   : > { %v355_v55 = vpop.f32.mrf.mxu3 }
 0x145   : > { %v359_v59 = vsub.f32 %v355_v55, %v301_v52  ;;  %558 = vrcp.f32 %v424_v58 }
 0x147   : > { %v421_v61 = vadd.f32 %v415_v57, %v359_v59 }
 0x149   : > { %v423_v6 = vadd.f32 0.0009, %v421_v61 }
 0x14b   : > { %v425_v9 = vmul.f32 %v423_v6, %v419_v63  ;;  %v559_v14 = vpop.eup %558 }
 0x14c   : > { %v428_v18 = vmul.f32 %v559_v14, %v298_v15 }
 0x14d   : > { %560 = vrcp.f32 %v425_v9 }
 0x14e   : > { %v430_v21 = vsel %vm107_vm0, %v428_v18, 0.0 }
 0x153   : > { %v561_v19 = vpop.eup %560 }
 0x154   : > { %v429_v20 = vmul.f32 %v561_v19, %v299_v17 }
 0x156   : > { %v431_v22 = vsel %vm107_vm0, %v429_v20, 0.0 }
 0x157   : > { %v432_v23 = vadd.f32 %v431_v22, %v430_v21 }
 0x159   : > { %433 = vadd.xlane.f32.xlu0 %v432_v23 }
 0x16d   : > { %s523_s15 = spop %522 }
 0x16e   : > { %v120_v38 = vstv %s523_s15 }
 0x16f   : > { %v121_v39 = vadd.f32 %v734_v5, %v120_v38  }
 0x171   : > { %v905_v5 = vmov %v121_v39  ;;  %445 = vst.msk [vmem:[#allocation10] sm:$0x1] (%p90_p0), %vm444_vm1, %v121_v39 }
 0x172   :  { %457 = dma.vmem_to_hbm [thread:$0]  (%p90_p0), %s453_s21, 16, %s455_s19, [#allocation4]  }
 0x1cc   : > { %v434_v31 = vpop.xlane.xlu0 %433 }
 0x1cd   : > { %v435_v32 = vrot.slane %v434_v31, 4 }
 0x1cf   : > { %v436_v33 = vadd.f32 %v435_v32, %v434_v31 }
 0x1d1   : > { %v437_v34 = vrot.slane %v436_v33, 2 }
 0x1d3   : > { %v438_v35 = vadd.f32 %v437_v34, %v436_v33 }
 0x1d5   : > { %v439_v36 = vrot.slane %v438_v35, 1 }
 0x1d7   : > { %v440_v37 = vadd.f32 %v439_v36, %v438_v35 }
 0x1d9   : > { %524 = vpush %v440_v37 }
 0x20a   : > { %s525_s16 = spop %524  ;;  %92 = sbr.rel (!%p90_p0) target bundleno = 22 (0x16), region = 69 }
 0x20b   : > { %v442_v40 = vstv %s525_s16 }
 0x20c   : > { %v443_v41 = vadd.f32 %v730_v4, %v442_v40  }
 0x20e   : > { %v904_v4 = vmov %v443_v41  ;;  %446 = vst.msk [vmem:[#allocation11] sm:$0x1] (%p90_p0), %vm444_vm1, %v443_v41 }
 0x20f   :  { %468 = dma.vmem_to_hbm [thread:$0]  %s464_s23, 16, %s466_s26, [#allocation12]  }
 0x210   :  { %724 = dma.done.wait [#allocation4], 16  }
 0x211   :  { %725 = vsyncadd [#allocation4], 4294967280 }
 0x212   :  { %726 = dma.done.wait [#allocation12], 16  }
 0x213   :  { %727 = vsyncadd [#allocation12], 4294967280 }
 0x214   :  { %477 = vsyncpa [#allocation3], 1 }
 0x215   :  { %478 = vsyncpa [#allocation6], 1 }
 0x216   :  { %479 = vsyncpa [#allocation9], 1 }
 0x217   :  { %480 = vsyncpa [#allocation4], 1 }
 0x218   :  { %481 = vsyncpa [#allocation12], 1 }

</bundles_post_ra>
